<compile_context>
chip_gen: v5e
topology: v5e:2x2
jax: 0.10.0
libtpu: 0.0.40
codegen_flags: <defaults>
</compile_context>

<pallas_src>
import jax
import jax.numpy as jnp
from jax.experimental import pallas as pl
from jax.experimental.pallas import tpu as pltpu  # noqa: F401  (kept for TPU-targeted builds)


def _identity_kernel(x_ref, o_ref):
    # Whole-array pass-through: one lane-dense block, one load, one store.
    o_ref[...] = x_ref[...]


def regressor_forward(x: jax.Array) -> jax.Array:
    """Pallas equivalent of Regressor.forward (a no-op on the tensor).

    Routes the input through a single-block, lane-dense Pallas identity copy
    and returns it unchanged.
    """
    orig_shape = x.shape
    n = x.size

    if n % 128 == 0:
        # Lane-dense 2D slab: last dim = 128 lanes, e.g. 2*4*16*16 f32 -> (16, 128),
        # which is exactly two (8, 128) vregs -> unmasked full-width stores.
        slab = x.reshape(n // 128, 128)
    else:
        # Fallback: full-array block in its original shape (full dims are always
        # a legal block shape).  Only hit for sizes not divisible by 128.
        slab = x.reshape(1, n)

    out = pl.pallas_call(
        _identity_kernel,
        out_shape=jax.ShapeDtypeStruct(slab.shape, slab.dtype),
        # No grid: one invocation owns the whole (tiny) array.
        in_specs=[pl.BlockSpec(slab.shape, lambda: (0, 0))],
        out_specs=pl.BlockSpec(slab.shape, lambda: (0, 0)),
        # Identity => output may alias the input buffer (no extra HBM write
        # when the caller donates; XLA inserts a defensive copy otherwise).
        input_output_aliases={0: 0},
    )(slab)

    return out.reshape(orig_shape)


if __name__ == "__main__":
    key = jax.random.PRNGKey(0)
    # Small NCHW input consistent with a generic Component forward signature.
    x = jax.random.normal(key, (2, 4, 16, 16), dtype=jnp.float32)

    y = regressor_forward(x)
    jax.block_until_ready(y)

    # Sanity check: identity semantics (the only well-defined tensor mapping
    # we can attach to a `pass` forward).
    assert y.shape == x.shape
    assert jnp.array_equal(y, x)

    print("KERNEL_OK")
</pallas_src>

<mosaic_0001>
module attributes {stable_mosaic.version = 11 : i64} {
  func.func @_identity_kernel(%arg0: memref<16x128xf32, #tpu.memory_space<vmem>>, %arg1: memref<16x128xf32, #tpu.memory_space<vmem>>) attributes {dimension_semantics = [], scalar_prefetch = 0 : i64, scratch_operands = 0 : i64, tpu.core_type = #tpu.core_type<tc>} {
    %c0 = arith.constant 0 : index
    %c0_0 = arith.constant 0 : index
    %0 = vector.load %arg0[%c0, %c0_0] : memref<16x128xf32, #tpu.memory_space<vmem>>, vector<16x128xf32>
    %c0_1 = arith.constant 0 : index
    %c0_2 = arith.constant 0 : index
    %1 = vector.load %arg1[%c0_1, %c0_2] : memref<16x128xf32, #tpu.memory_space<vmem>>, vector<16x128xf32>
    tpu.vector_store %arg1[%c0_1, %c0_2], %0 {strides = array<i32>} : memref<16x128xf32, #tpu.memory_space<vmem>>, vector<16x128xf32>,
    return
  }
}

</mosaic_0001>

<bundles_post_ra>
// kernel: tpu_custom_call.1
= control target key start
LH: loop header
LB: loop body
LE: loop exit
PB: predicated region body
PF: predicated region fallthrough
CT: control target
= control target key end

     0   :  { %6 = vsyncpa [#allocation3], 0  ;;  %s124_s0 = inlined_call_operand.hbm [shape: f32[16,128], index: 0, kind: input, shape index: {}, may-alias: {0,1}]   ;;  %s125_s1 = inlined_call_operand.hbm [shape: f32[16,128], index: 1, kind: output, shape index: {}, may-alias: {0,1}]  }
   0x1   :  { %7 = vsyncpa [#allocation4], 0  ;;  %s12_s8 = sshll.u32 %s124_s0, 4  ;;  %s104_s9 = smov [#allocation2]   ;;  %s13_s8 = int_to_ptr.hbm [resolvable:$true] %s12_s8 }
   0x2   :  { %s14_s10 = sshll.u32 %s104_s9, 4  ;;  %s105_s11 = smov 128   ;;  %s15_s10 = int_to_ptr.vmem [resolvable:$true] %s14_s10 }
   0x3   :  { %s106_s12 = smov 8  }
   0x4   :  { %20 = dma.hbm_to_vmem [thread:$0]  %s13_s8, 256, %s15_s10, [#allocation3], %s105_s11, %s105_s11, %s106_s12  }
   0x5   :  { %100 = dma.done.wait [#allocation3], 256  }
   0x6   :  { %101 = vsyncadd [#allocation3], 4294967040  ;;  %s107_s13 = smov [#allocation5]   ;;  %s35_s17 = sshll.u32 %s125_s1, 4  ;;  %v25_v0 = vld [vmem:[#allocation2] sm:$0xff]  ;;  %v26_v1 = vld [vmem:[#allocation2 + $0x8] sm:$0xff]  ;;  %s36_s17 = int_to_ptr.hbm [resolvable:$true] %s35_s17 }
   0x7   :  { %s33_s14 = sshll.u32 %s107_s13, 4  ;;  %27 = vst [vmem:[#allocation5] sm:$0xff] %v25_v0  ;;  %s34_s14 = int_to_ptr.vmem [resolvable:$true] %s33_s14 }
   0x8   :  { %28 = vst [vmem:[#allocation5 + $0x8] sm:$0xff] %v26_v1 }
   0x9   :  { %41 = dma.vmem_to_hbm [thread:$0]  %s34_s14, 256, %s36_s17, [#allocation4], %s105_s11, %s105_s11, %s106_s12  }
   0xa   :  { %102 = dma.done.wait [#allocation4], 256  }
   0xb   :  { %103 = vsyncadd [#allocation4], 4294967040 }
   0xc   :  { %46 = vsyncpa [#allocation3], 1 }
   0xd   :  { %47 = vsyncpa [#allocation4], 1 }

</bundles_post_ra>
